<compile_context>
chip_gen: v7x
topology: tpu7x:2x2x1
jax: 0.10.0
libtpu: 0.0.40
codegen_flags: <defaults>
</compile_context>

<pallas_src>
import functools

import numpy as np
import jax
import jax.numpy as jnp
from jax.experimental import pallas as pl
from jax.experimental.pallas import tpu as pltpu


def _detect_level_kernel(x_ref, w_ref, coef_ref, gxy_ref, *out_refs, emit_x):
    # x_ref    : (1, C, TN)   activations in native dtype (cast to bf16 here)
    # w_ref    : (na*no, C)   bf16 1x1-conv weight
    # coef_ref : (na*no, 8)   f32 [A, bgx, bgy, bc, c_sig, c_sq, c_raw, bias]
    # gxy_ref  : (2, TN)      f32 [grid_x*stride ; grid_y*stride]
    coef = coef_ref[...]

    conv = jnp.dot(w_ref[...], x_ref[0].astype(jnp.bfloat16),
                   preferred_element_type=jnp.float32) + coef[:, 7:8]   # (48, TN)

    gx = gxy_ref[0:1, :]                     # (1, TN), already * stride
    gy = gxy_ref[1:2, :]

    s = jax.nn.sigmoid(conv)                                            # EUP
    val = s * coef[:, 4:5] + (s * s) * coef[:, 5:6] + conv * coef[:, 6:7]
    y = val * coef[:, 0:1] + (coef[:, 1:2] * gx + coef[:, 2:3] * gy + coef[:, 3:4])

    if emit_x:
        yout_ref, xout_ref = out_refs
        xout_ref[0] = conv.astype(xout_ref.dtype)
    else:
        (yout_ref,) = out_refs
    yout_ref[0] = y


def _build_decode_coefs(na, no, stride, anchors_level):
    """(na*no, 7) table: [A, bgx, bgy, bc, c_sig, c_sq, c_raw] (bias appended later)."""
    n = na * no
    coef = np.zeros((n, 7), np.float32)
    for a in range(na):
        aw = float(anchors_level[a, 0])
        ah = float(anchors_level[a, 1])
        base = a * no
        # box x / y : (sig*2 - 0.5 + grid) * stride
        coef[base + 0, [0, 1, 3, 4]] = [2.0 * stride, 1.0, -0.5 * stride, 1.0]
        coef[base + 1, [0, 2, 3, 4]] = [2.0 * stride, 1.0, -0.5 * stride, 1.0]
        # box w / h : (sig*2)^2 * anchor
        coef[base + 2, [0, 5]] = [4.0 * aw, 1.0]
        coef[base + 3, [0, 5]] = [4.0 * ah, 1.0]
        # objectness : sigmoid
        coef[base + 4, [0, 4]] = [1.0, 1.0]
        # landmarks 5..14 : raw * anchor + grid * stride (x/y alternate)
        for k in range(5):
            coef[base + 5 + 2 * k, [0, 1, 6]] = [aw, 1.0, 1.0]
            coef[base + 6 + 2 * k, [0, 2, 6]] = [ah, 1.0, 1.0]
        # class score channel 15 : sigmoid.  The torch spec literally only
        # sigmoids channel 15 and leaves channels >15 at zero (torch.full_like 0),
        # so rows >15 stay all-zero here to match the given module exactly.
        coef[base + 15, [0, 4]] = [1.0, 1.0]
    return coef


def _build_grid_xy(ny, nx, stride):
    yv, xv = np.meshgrid(np.arange(ny), np.arange(nx), indexing='ij')
    gxy = np.stack([xv.reshape(-1), yv.reshape(-1)], axis=0).astype(np.float32)
    return gxy * float(stride)                                          # (2, ny*nx)


def detect_level(x_nchw, w, b, stride, anchors_level, *,
                 emit_x=True, x_out_dtype=jnp.float32, torch_layout=True):
    """One detection level.

    x_nchw: (B, C, ny, nx) activations (any float dtype; cast to bf16 in-kernel)
    w: (na*no, C) 1x1-conv weight; b: (na*no,) bias.
    Returns (z, x_out):
      torch_layout=True : z (B, na*ny*nx, no), x_out (B, na, ny, nx, no) or None
      torch_layout=False: z (B, na*no, ny*nx) lane-dense, x_out same layout or None
    """
    B, C, ny, nx = x_nchw.shape
    na = anchors_level.shape[0]
    no = w.shape[0] // na
    N = ny * nx
    tn = N if N <= 1024 else 1024            # 512-1024 tiles ~85% of HBM roofline
    grid = (B, pl.cdiv(N, tn))               # ragged last block is masked by Pallas

    x_flat = x_nchw.reshape(B, C, N)                         # native dtype, no copy pass
    w_bf = w.astype(jnp.bfloat16)
    coef = jnp.concatenate(
        [jnp.asarray(_build_decode_coefs(na, no, float(stride),
                                         np.asarray(anchors_level, np.float32))),
         b.reshape(na * no, 1).astype(jnp.float32)], axis=1)  # (48, 8)
    gxy = jnp.asarray(_build_grid_xy(ny, nx, stride))         # (2, N)

    kernel = functools.partial(_detect_level_kernel, emit_x=emit_x)

    out_shape = [jax.ShapeDtypeStruct((B, na * no, N), jnp.float32)]
    out_specs = [pl.BlockSpec((1, na * no, tn), lambda bi, j: (bi, 0, j))]
    if emit_x:
        out_shape.append(jax.ShapeDtypeStruct((B, na * no, N), x_out_dtype))
        out_specs.append(pl.BlockSpec((1, na * no, tn), lambda bi, j: (bi, 0, j)))

    outs = pl.pallas_call(
        kernel,
        out_shape=tuple(out_shape),
        grid_spec=pltpu.PrefetchScalarGridSpec(
            num_scalar_prefetch=0,
            grid=grid,
            in_specs=[pl.BlockSpec((1, C, tn), lambda bi, j: (bi, 0, j)),
                      pl.BlockSpec((na * no, C), lambda bi, j: (0, 0)),
                      pl.BlockSpec((na * no, 8), lambda bi, j: (0, 0)),
                      pl.BlockSpec((2, tn), lambda bi, j: (0, j))],
            out_specs=tuple(out_specs)),
        compiler_params=pltpu.CompilerParams(
            dimension_semantics=("parallel", "parallel")),
    )(x_flat, w_bf, coef, gxy)

    if emit_x:
        yout, xout = outs
    else:
        (yout,) = outs
        xout = None

    if not torch_layout:
        return yout, xout                                    # lane-dense canonical layout

    # Torch output contract (pure layout; callers that accept (B, na*no, N) skip this).
    z = yout.reshape(B, na, no, ny, nx).transpose(0, 1, 3, 4, 2).reshape(B, na * N, no)
    x_perm = None
    if emit_x:
        x_perm = xout.reshape(B, na, no, ny, nx).transpose(0, 1, 3, 4, 2)
    return z, x_perm


class DetectPallas:
    """Inference (eval-mode) forward of yolov5face Detect."""
    # TODO(synk): the training / export branches of the torch module return only
    # the raw conv outputs; that is exactly the emit_x path (x_out) and is not
    # wired as a separate mode here.

    def __init__(self, nc, anchors, ch, strides, key):
        self.nc = nc
        self.no = nc + 5 + 10
        self.nl = len(anchors)
        self.na = len(anchors[0]) // 2
        self.anchors = np.asarray(anchors, np.float32).reshape(self.nl, self.na, 2)
        self.strides = [float(s) for s in strides]
        self.w, self.b = [], []
        for c in ch:
            key, kw, kb = jax.random.split(key, 3)
            self.w.append(0.1 * jax.random.normal(kw, (self.no * self.na, c), jnp.float32))
            self.b.append(0.1 * jax.random.normal(kb, (self.no * self.na,), jnp.float32))

    def __call__(self, xs, *, emit_x=True, torch_layout=True):
        z_list, x_list = [], []
        for i in range(self.nl):
            z, x_out = detect_level(xs[i], self.w[i], self.b[i],
                                    self.strides[i], self.anchors[i],
                                    emit_x=emit_x, torch_layout=torch_layout)
            z_list.append(z)
            x_list.append(x_out)
        if torch_layout:
            return jnp.concatenate(z_list, axis=1), x_list
        return z_list, x_list


def _reference_level(x, w, b, stride, anchors_level):
    """Pure-numpy mirror of the PyTorch eval forward for one level."""
    B, C, ny, nx = x.shape
    na = anchors_level.shape[0]
    no = w.shape[0] // na
    conv = np.einsum('oc,bchw->bohw', w, x) + b[None, :, None, None]
    xp = conv.reshape(B, na, no, ny, nx).transpose(0, 1, 3, 4, 2)
    yv, xv = np.meshgrid(np.arange(ny), np.arange(nx), indexing='ij')
    grid = np.stack((xv, yv), 2).reshape(1, 1, ny, nx, 2).astype(np.float32)
    anchor_grid = anchors_level.reshape(1, na, 1, 1, 2)
    y = np.zeros_like(xp)
    sig = 1.0 / (1.0 + np.exp(-xp))
    idx = [0, 1, 2, 3, 4, 15]
    y[..., idx] = sig[..., idx]
    y[..., 5:15] = xp[..., 5:15]
    y[..., 0:2] = (y[..., 0:2] * 2.0 - 0.5 + grid) * stride
    y[..., 2:4] = (y[..., 2:4] * 2.0) ** 2 * anchor_grid
    for k in range(5, 15, 2):
        y[..., k:k + 2] = y[..., k:k + 2] * anchor_grid + grid * stride
    return xp, y.reshape(B, -1, no)


def _bf16_round(a):
    """Round to bf16 and back (matches the precision the kernel feeds the MXU)."""
    return np.asarray(jnp.asarray(a).astype(jnp.bfloat16).astype(jnp.float32))


if __name__ == "__main__":
    key = jax.random.PRNGKey(0)
    nc = 1                                   # yolov5face: 1 face class -> no = 16
    anchors = ((4, 5, 8, 10, 13, 16),
               (23, 29, 43, 55, 73, 105))    # nl = 2, na = 3
    ch = (8, 16)
    strides = (8.0, 16.0)
    B = 2
    spatial = ((8, 8), (4, 4))

    key, kmod = jax.random.split(key)
    det = DetectPallas(nc, anchors, ch, strides, kmod)

    xs = []
    for (c, (ny, nx)) in zip(ch, spatial):
        key, kx = jax.random.split(key)
        xs.append(jax.random.normal(kx, (B, c, ny, nx), jnp.float32))

    # Default path: torch output contract (z concat + permuted raw conv outputs).
    z, x_out = det(xs)
    jax.block_until_ready(z)
    for t in x_out:
        jax.block_until_ready(t)

    # Fast inference-only path: lane-dense z, no xout emitted / no transposes.
    z_fast, _ = det(xs, emit_x=False, torch_layout=False)
    for t in z_fast:
        jax.block_until_ready(t)

    # Verify against a pure-numpy mirror of the PyTorch forward; the reference
    # uses bf16-rounded activations/weights (same precision the MXU sees).
    z_refs, x_refs = [], []
    for i in range(det.nl):
        xr, zr = _reference_level(_bf16_round(xs[i]), _bf16_round(det.w[i]),
                                  np.asarray(det.b[i]), det.strides[i],
                                  det.anchors[i])
        x_refs.append(xr)
        z_refs.append(zr)
    z_ref = np.concatenate(z_refs, axis=1)

    np.testing.assert_allclose(np.asarray(z), z_ref, rtol=2e-3, atol=2e-3)
    for a, b_ in zip(x_out, x_refs):
        np.testing.assert_allclose(np.asarray(a), b_, rtol=2e-3, atol=2e-3)

    # The fast-path z (lane-dense) must match too once re-laid-out.
    for i, zl in enumerate(z_fast):
        Bi, _, ny, nx = xs[i].shape
        zl_t = np.asarray(zl).reshape(Bi, det.na, det.no, ny, nx)
        zl_t = zl_t.transpose(0, 1, 3, 4, 2).reshape(Bi, -1, det.no)
        np.testing.assert_allclose(zl_t, z_refs[i], rtol=2e-3, atol=2e-3)

    print("KERNEL_OK")
</pallas_src>

<mosaic_0001>
module attributes {stable_mosaic.version = 11 : i64} {
  func.func @_detect_level_kernel(%arg0: i32, %arg1: i32, %arg2: memref<1x8x64xf32, #tpu.memory_space<vmem>>, %arg3: memref<48x8xbf16, #tpu.memory_space<vmem>>, %arg4: memref<48x8xf32, #tpu.memory_space<vmem>>, %arg5: memref<2x64xf32, #tpu.memory_space<vmem>>, %arg6: memref<1x48x64xf32, #tpu.memory_space<vmem>>, %arg7: memref<1x48x64xf32, #tpu.memory_space<vmem>>) attributes {dimension_semantics = [#tpu.dimension_semantics<parallel>, #tpu.dimension_semantics<parallel>], iteration_bounds = array<i64: 2, 1>, scalar_prefetch = 0 : i64, scratch_operands = 0 : i64, tpu.core_type = #tpu.core_type<tc>, window_params = [{transform_indices = @transform_0, window_bounds = array<i64: 1, 8, 64>}, {pipeline_mode = #tpu.pipeline_mode<synchronous>, transform_indices = @transform_1, window_bounds = array<i64: 48, 8>}, {pipeline_mode = #tpu.pipeline_mode<synchronous>, transform_indices = @transform_2, window_bounds = array<i64: 48, 8>}, {transform_indices = @transform_3, window_bounds = array<i64: 2, 64>}, {transform_indices = @transform_4, window_bounds = array<i64: 1, 48, 64>}, {transform_indices = @transform_5, window_bounds = array<i64: 1, 48, 64>}]} {
    %c0 = arith.constant 0 : index
    %c0_0 = arith.constant 0 : index
    %0 = vector.load %arg4[%c0, %c0_0] : memref<48x8xf32, #tpu.memory_space<vmem>>, vector<48x8xf32>
    %c0_1 = arith.constant 0 : index
    %c0_2 = arith.constant 0 : index
    %1 = vector.load %arg3[%c0_1, %c0_2] : memref<48x8xbf16, #tpu.memory_space<vmem>>, vector<48x8xbf16>
    %c0_3 = arith.constant 0 : index
    %c0_4 = arith.constant 0 : index
    %c0_5 = arith.constant 0 : index
    %2 = vector.load %arg2[%c0_3, %c0_4, %c0_5] : memref<1x8x64xf32, #tpu.memory_space<vmem>>, vector<1x8x64xf32>
    %3 = vector.shape_cast %2 : vector<1x8x64xf32> to vector<8x64xf32>
    %4 = arith.truncf %3 : vector<8x64xf32> to vector<8x64xbf16>
    %cst = arith.constant dense<0.000000e+00> : vector<48x64xf32>
    %5 = tpu.matmul %1, %4, %cst {dimension_numbers = #tpu.dot_dimension_numbers<[1], [0], [0], [1], [0, 0, 1, 1], [], []>} : vector<48x8xbf16>, vector<8x64xbf16>, vector<48x64xf32> -> vector<48x64xf32>
    %6 = vector.extract_strided_slice %0 {offsets = [0, 7], sizes = [48, 1], strides = [1, 1]} : vector<48x8xf32> to vector<48x1xf32>
    %7 = vector.broadcast %6 : vector<48x1xf32> to vector<48x64xf32>
    %8 = arith.addf %5, %7 : vector<48x64xf32>
    %c0_6 = arith.constant 0 : index
    %c0_7 = arith.constant 0 : index
    %9 = vector.load %arg5[%c0_6, %c0_7] : memref<2x64xf32, #tpu.memory_space<vmem>>, vector<1x64xf32>
    %c1 = arith.constant 1 : index
    %c0_8 = arith.constant 0 : index
    %10 = vector.load %arg5[%c1, %c0_8] : memref<2x64xf32, #tpu.memory_space<vmem>>, vector<1x64xf32>
    %11 = arith.negf %8 : vector<48x64xf32>
    %12 = math.exp %11 : vector<48x64xf32>
    %cst_9 = arith.constant 1.000000e+00 : f32
    %13 = vector.broadcast %cst_9 : f32 to vector<48x64xf32>
    %14 = arith.addf %13, %12 : vector<48x64xf32>
    %15 = arith.divf %13, %14 : vector<48x64xf32>
    %16 = vector.extract_strided_slice %0 {offsets = [0, 4], sizes = [48, 1], strides = [1, 1]} : vector<48x8xf32> to vector<48x1xf32>
    %17 = vector.broadcast %16 : vector<48x1xf32> to vector<48x64xf32>
    %18 = arith.mulf %15, %17 : vector<48x64xf32>
    %19 = arith.mulf %15, %15 : vector<48x64xf32>
    %20 = vector.extract_strided_slice %0 {offsets = [0, 5], sizes = [48, 1], strides = [1, 1]} : vector<48x8xf32> to vector<48x1xf32>
    %21 = vector.broadcast %20 : vector<48x1xf32> to vector<48x64xf32>
    %22 = arith.mulf %19, %21 : vector<48x64xf32>
    %23 = arith.addf %18, %22 : vector<48x64xf32>
    %24 = vector.extract_strided_slice %0 {offsets = [0, 6], sizes = [48, 1], strides = [1, 1]} : vector<48x8xf32> to vector<48x1xf32>
    %25 = vector.broadcast %24 : vector<48x1xf32> to vector<48x64xf32>
    %26 = arith.mulf %8, %25 : vector<48x64xf32>
    %27 = arith.addf %23, %26 : vector<48x64xf32>
    %28 = vector.extract_strided_slice %0 {offsets = [0, 0], sizes = [48, 1], strides = [1, 1]} : vector<48x8xf32> to vector<48x1xf32>
    %29 = vector.broadcast %28 : vector<48x1xf32> to vector<48x64xf32>
    %30 = arith.mulf %27, %29 : vector<48x64xf32>
    %31 = vector.extract_strided_slice %0 {offsets = [0, 1], sizes = [48, 1], strides = [1, 1]} : vector<48x8xf32> to vector<48x1xf32>
    %32 = vector.broadcast %31 : vector<48x1xf32> to vector<48x64xf32>
    %33 = vector.broadcast %9 : vector<1x64xf32> to vector<48x64xf32>
    %34 = arith.mulf %32, %33 : vector<48x64xf32>
    %35 = vector.extract_strided_slice %0 {offsets = [0, 2], sizes = [48, 1], strides = [1, 1]} : vector<48x8xf32> to vector<48x1xf32>
    %36 = vector.broadcast %35 : vector<48x1xf32> to vector<48x64xf32>
    %37 = vector.broadcast %10 : vector<1x64xf32> to vector<48x64xf32>
    %38 = arith.mulf %36, %37 : vector<48x64xf32>
    %39 = arith.addf %34, %38 : vector<48x64xf32>
    %40 = vector.extract_strided_slice %0 {offsets = [0, 3], sizes = [48, 1], strides = [1, 1]} : vector<48x8xf32> to vector<48x1xf32>
    %41 = vector.broadcast %40 : vector<48x1xf32> to vector<48x64xf32>
    %42 = arith.addf %39, %41 : vector<48x64xf32>
    %43 = arith.addf %30, %42 : vector<48x64xf32>
    %c0_10 = arith.constant 0 : index
    %c0_11 = arith.constant 0 : index
    %c0_12 = arith.constant 0 : index
    %44 = vector.load %arg7[%c0_10, %c0_11, %c0_12] : memref<1x48x64xf32, #tpu.memory_space<vmem>>, vector<1x48x64xf32>
    %45 = vector.shape_cast %44 : vector<1x48x64xf32> to vector<48x64xf32>
    %46 = vector.shape_cast %8 : vector<48x64xf32> to vector<1x48x64xf32>
    tpu.vector_store %arg7[%c0_10, %c0_11, %c0_12], %46 {strides = array<i32>} : memref<1x48x64xf32, #tpu.memory_space<vmem>>, vector<1x48x64xf32>,
    %c0_13 = arith.constant 0 : index
    %c0_14 = arith.constant 0 : index
    %c0_15 = arith.constant 0 : index
    %47 = vector.load %arg6[%c0_13, %c0_14, %c0_15] : memref<1x48x64xf32, #tpu.memory_space<vmem>>, vector<1x48x64xf32>
    %48 = vector.shape_cast %47 : vector<1x48x64xf32> to vector<48x64xf32>
    %49 = vector.shape_cast %43 : vector<48x64xf32> to vector<1x48x64xf32>
    tpu.vector_store %arg6[%c0_13, %c0_14, %c0_15], %49 {strides = array<i32>} : memref<1x48x64xf32, #tpu.memory_space<vmem>>, vector<1x48x64xf32>,
    return
  }
  func.func @transform_0(%arg0: i32, %arg1: i32) -> (i32, i32, i32) {
    %c0_i32 = arith.constant 0 : i32
    %c0_i32_0 = arith.constant 0 : i32
    return %arg0, %c0_i32, %arg1 : i32, i32, i32
  }
  func.func @transform_1(%arg0: i32, %arg1: i32) -> (i32, i32) {
    %c0_i32 = arith.constant 0 : i32
    %c0_i32_0 = arith.constant 0 : i32
    %c0_i32_1 = arith.constant 0 : i32
    return %c0_i32, %c0_i32_0 : i32, i32
  }
  func.func @transform_2(%arg0: i32, %arg1: i32) -> (i32, i32) {
    %c0_i32 = arith.constant 0 : i32
    %c0_i32_0 = arith.constant 0 : i32
    %c0_i32_1 = arith.constant 0 : i32
    return %c0_i32, %c0_i32_0 : i32, i32
  }
  func.func @transform_3(%arg0: i32, %arg1: i32) -> (i32, i32) {
    %c0_i32 = arith.constant 0 : i32
    %c0_i32_0 = arith.constant 0 : i32
    return %c0_i32, %arg1 : i32, i32
  }
  func.func @transform_4(%arg0: i32, %arg1: i32) -> (i32, i32, i32) {
    %c0_i32 = arith.constant 0 : i32
    %c0_i32_0 = arith.constant 0 : i32
    return %arg0, %c0_i32, %arg1 : i32, i32, i32
  }
  func.func @transform_5(%arg0: i32, %arg1: i32) -> (i32, i32, i32) {
    %c0_i32 = arith.constant 0 : i32
    %c0_i32_0 = arith.constant 0 : i32
    return %arg0, %c0_i32, %arg1 : i32, i32, i32
  }
}

</mosaic_0001>

<bundles_post_ra>
// kernel: tpu_custom_call.1
= control target key start
LH: loop header
LB: loop body
LE: loop exit
PB: predicated region body
PF: predicated region fallthrough
CT: control target
= control target key end

     0   :  { %11 = vsyncpa [#allocation3], 0  ;;  %s1606_s0 = inlined_call_operand.vmem [shape: f32[2,8,64], index: 0, kind: input, shape index: {}]   ;;  %s1607_s1 = inlined_call_operand.vmem [shape: bf16[48,8], index: 1, kind: input, shape index: {}]   ;;  %s1608_s2 = inlined_call_operand.vmem [shape: f32[48,8], index: 2, kind: input, shape index: {}]   ;;  %s1609_s3 = inlined_call_operand.vmem [shape: f32[2,64], index: 3, kind: input, shape index: {}]   ;;  %s1610_s4 = inlined_call_operand.hbm [shape: f32[2,48,64], index: 4, kind: output, shape index: {0}]   ;;  %s1611_s5 = inlined_call_operand.hbm [shape: f32[2,48,64], index: 5, kind: output, shape index: {1}]  }
   0x1   :  { %13 = vsyncpa [#allocation3 + $0x1], 0 }
   0x2   :  { %14 = vsyncpa [#allocation5], 0 }
   0x3   :  { %16 = vsyncpa [#allocation5 + $0x1], 0  ;;  %s1185_s18 = smov 0   ;;  %s1187_s19 = smov 0  }
   0x4   :  { %s1189_s20 = smov 0   ;;  %s1191_s21 = smov 0  }
   0x5   :  { %s1193_s22 = smov 0   ;;  %s1195_s23 = smov 0  }
   0x6 LB: > { %s866_s24 = sadd.s32 4294967295, %s1139_s23   ;;  %s867_s25 = sadd.s32 4294967294, %s1139_s23   ;;  %s1139_s23 = sphi %s1195_s23, %s22_s23   ;;  %s1135_s22 = sphi %s1193_s22, %s1618_s22   ;;  %s1131_s21 = sphi %s1191_s21, %s1617_s21   ;;  %s1127_s20 = sphi %s1189_s20, %s1616_s20   ;;  %s1123_s19 = sphi %s1187_s19, %s1615_s19   ;;  %s1119_s18 = sphi %s1185_s18, %s1614_s18  }
   0x7   : > { %s34_s26 = sadd.s32 1, %s1135_s22  ;;  %s139_s27 = sadd.s32 1, %s1127_s20 }
   0x8   : > { %p36_p0 = scmp.ge.s32.totalorder %s34_s26, 2  ;;  %p149_p1 = scmp.ne.s32.totalorder %s1127_s20, %s1123_s19 }
   0x9   : > { %p150_p2 = scmp.eq.s32.totalorder %s866_s24, 1  ;;  %p155_p3 = scmp.ne.s32.totalorder %s1123_s19, %s1119_s18 }
   0xa   : > { %s1620_s26 = smov (%p36_p0, %s34_s26), 0  ;;  %p156_p5 = scmp.eq.s32.totalorder %s867_s25, 1 }
   0xb   : > { %p1225_p4 = por %p150_p2, %p149_p1  ;;  %s134_s29 = ssub.s32 %s1135_s22, %s1620_s26 }
   0xc   : > { %p871_p6 = scmp.ge.s32.totalorder %s1139_s23, 1  ;;  %p137_p7 = scmp.eq.s32.totalorder %s134_s29, 0 }
   0xd   : > { %p1232_p8 = por %p156_p5, %p155_p3  ;;  %p225_p9 = scmp.lt.s32.totalorder %s1139_s23, 3 }
   0xe   : > { %s1238_s6 = scalar_select %p137_p7, %s1127_s20, %s139_s27  }
   0xf   : > { %p226_p10 = pnand %p871_p6, %p225_p9 }
  0x10   : > { %v1243_v0 = vld [vmem:[%s1608_s2 + $0x10] sm:$0xff] (!%p226_p10)  ;;  %p264_p11 = scmp.lt.s32.totalorder (!%p226_p10), %s1131_s21, 1  ;;  %v1141_v1 = vmov (!%p226_p10), 7   ;;  %v1142_v2 = vmov (!%p226_p10), 0.0   ;;  %v1251_v3 = vld [vmem:[%s1608_s2 + $0x18] sm:$0xff] (!%p226_p10)  ;;  %vm1143_vm0 = vmmov (!%p226_p10), 0  }
  0x11   : > { %229 = sbr.rel (%p226_p10) target bundleno = 324 (0x144), region = 36  ;;  %987 = vset.pattern.permute.xlu1 (!%p226_p10), %v1141_v1  ;;  %895 = vmatprep.subr.bf16.mxu0 (!%p226_p10), %v1142_v2  ;;  %v1261_v4 = vld [vmem:[%s1608_s2] sm:$0xff] (!%p226_p10)  ;;  %vm345_vm1 = vcmask (!%p226_p10), 1043456   ;;  %v1268_v6 = vld [vmem:[%s1608_s2 + $0x28] sm:$0xff] (!%p226_p10)  ;;  %vm335_vm2 = vcmask (!%p226_p10), 64512   ;;  %v1144_v12 = vmov (!%p226_p10), 4  }
  0x12   : > { %302 = vperm.xlu1 (!%p226_p10), %987, %v1243_v0   ;;  %909 = vmatprep.subr.bf16.mxu1 (!%p226_p10), %v1142_v2  ;;  %v1002_v9 = vld [vmem:[%s1607_s1] sm:$0xff] (!%p226_p10)   ;;  %v1003_v10 = vld [vmem:[%s1607_s1 + $0x8] sm:$0xff] (!%p226_p10)   ;;  %v1004_v14 = vld [vmem:[%s1607_s1 + $0x10] sm:$0xff] (!%p226_p10)   ;;  %v1145_v15 = vmov (!%p226_p10), 5   ;;  %v1146_v16 = vmov (!%p226_p10), 6   ;;  %v1147_v17 = vmov (!%p226_p10), 0  }
  0x13   : > { %897 = vmatprep.mubr.msk.bf16.mxu0 (!%p226_p10), %vm1143_vm0, %v1142_v2  ;;  %901 = vmatprep.mubr.msk.bf16.mxu1 (!%p226_p10), %vm1143_vm0, %v1142_v2  ;;  %v1280_v11 = vld [vmem:[%s1608_s2 + $0x8] sm:$0xff] (!%p226_p10)  ;;  %v280_v13 = vld [vmem:[%s1608_s2 + $0x20] sm:$0xff] (!%p226_p10)  ;;  %v1148_v18 = vmov (!%p226_p10), 1   ;;  %v1149_v19 = vmov (!%p226_p10), 2   ;;  %v1150_v20 = vmov (!%p226_p10), 3   ;;  %vm692_vm3 = vcmask (!%p226_p10), 523264  }
  0x14   : > { %986 = vset.pattern.permute.xlu0 (!%p226_p10), %v1141_v1  ;;  %s912_s24 = smul.u32 (!%p226_p10), 768, %s1131_s21  ;;  %s1151_s10 = smov (!%p226_p10), [#allocation4]  }
  0x15   : > { %292 = vperm.xlu0 (!%p226_p10), %986, %v1261_v4   ;;  %s1033_s11 = sshll.u32 (!%p226_p10), %s1151_s10, 4  ;;  %s1034_s11 = int_to_ptr.vmem [resolvable:$false] %s1033_s11 }
  0x16   : > { %307 = vperm.xlu1 (!%p226_p10), %987, %v1251_v3   ;;  %s1440_s7 = scalar_lea.hbm (!%p226_p10), %s1611_s5, %s912_s24 }
  0x18   : > { %s265_s9 = scalar_select %p264_p11, %s1131_s21, 1 }
  0x19   : > { %297 = vperm.xlu0 %986, %v1280_v11  }
  0x1a   : > { %s872_s12 = sshll.u32 %s265_s9, 3  ;;  %317 = vperm.xlu1 %987, %v1268_v6  }
  0x1b   : > { %s270_s15 = scalar_lea.vmem %s1606_s0, %s872_s12  ;;  %s1035_s12 = scalar_lea.vmem %s1034_s11, 1536 }
  0x1c   : > { %v288_v5 = vld [vmem:[%s270_s15] sm:$0xff]  ;;  %s1381_s15 = sand.u32 1, %s1123_s19  }
  0x1d   : > { %v289_v7 = vpack.c.bf16 %v288_v5, %v288_v5  ;;  %312 = vperm.xlu0 %986, %v280_v13   ;;  %s911_s16 = smul.u32 48, %s1381_s15  ;;  %s711_s8 = scalar_lea.sflag [#allocation5], %s1381_s15 }
  0x1e   : > { %989 = vset.pattern.permute.xlu1 %v1144_v12 }
  0x1f   : > { %v347_v8 = vsel %vm345_vm1, %v289_v7, 0  ;;  %449 = vperm.xlu1 %989, %v1280_v11   ;;  %s1397_s17 = scalar_lea.vmem [#allocation4], %s911_s16 }
  0x20   : > { %896 = vmatpush3.bf16.msra.mxu0 %v347_v8  ;;  %910 = vmatpush3.bf16.msra.mxu1 %v347_v8  ;;  %s742_s25 = sshll.u32 %s1397_s17, 4  ;;  %s1442_s25 = int_to_ptr.vmem [resolvable:$true] %s742_s25 }
  0x21   : > { %988 = vset.pattern.permute.xlu0 %v1144_v12  ;;  %s1029_s9 = scalar_lea.vmem %s1442_s25, 768  ;;  %p1036_p1 = scmp.lt.s32.totalorder %s1442_s25, %s1034_s11 }
  0x22   : > { %445 = vperm.xlu0 %988, %v1261_v4   ;;  %p1030_p12 = scmp.ne.s32.totalorder %s1442_s25, %s1029_s9  ;;  %p1037_p2 = scmp.lt.s32.totalorder %s1035_s12, %s1029_s9 }
  0x23   : > { %898 = vmatmul.mubr.msk.bf16.vlgmr.msra.gmra.mrb[0].mxu0 %vm335_vm2, %v1002_v9  ;;  %902 = vmatmul.mubr.msk.bf16.vlgmr.msra.gmra.mrb[0].mxu1 %vm335_vm2, %v1003_v10 }
  0x24   : > { %905 = vmatprep.mubr.msk.bf16.mxu1 %vm1143_vm0, %v1142_v2  ;;  %453 = vperm.xlu1 %989, %v1243_v0   ;;  %p1031_p13 = pnand %p1030_p12, %p1225_p4  ;;  %p1038_p3 = por %p1037_p2, %p1036_p1 }
  0x26   : > { %457 = vperm.xlu0 %988, %v1251_v3   ;;  %p1032_p0 = pneg %p1031_p13 }
  0x28   : > { %461 = vperm.xlu1 %989, %v280_v13   ;;  %p1039_p5 = pnand %p1038_p3, %p1032_p0 }
  0x2a   : > { %465 = vperm.xlu0 %988, %v1268_v6  }
  0x2b   : > { %906 = vmatmul.mubr.msk.bf16.gmra.mrb[4].mxu1 %vm335_vm2, %v1004_v14 }
  0x2c   : > { %990 = vset.pattern.permute.xlu1 %v1145_v15 }
  0x2d   : > { %481 = vperm.xlu1 %990, %v1261_v4  }
  0x2e   : > { %991 = vset.pattern.permute.xlu0 %v1145_v15 }
  0x2f   : > { %485 = vperm.xlu0 %991, %v1280_v11  }
  0x31   : > { %489 = vperm.xlu1 %990, %v1243_v0  }
  0x33   : > { %497 = vperm.xlu0 %991, %v280_v13  }
  0x35   : > { %493 = vperm.xlu1 %990, %v1251_v3  }
  0x37   : > { %992 = vset.pattern.permute.xlu0 %v1146_v16 }
  0x38   : > { %517 = vperm.xlu0 %992, %v1261_v4  }
  0x39   : > { %501 = vperm.xlu1 %990, %v1268_v6  }
  0x3c   : > { %529 = vperm.xlu0 %992, %v1251_v3  }
  0x3d   : > { %993 = vset.pattern.permute.xlu1 %v1146_v16 }
  0x3e   : > { %521 = vperm.xlu1 %993, %v1280_v11  }
  0x40   : > { %537 = vperm.xlu0 %992, %v1268_v6  }
  0x42   : > { %525 = vperm.xlu1 %993, %v1243_v0  }
  0x44   : > { %995 = vset.pattern.permute.xlu0 %v1147_v17 }
  0x45   : > { %557 = vperm.xlu0 %995, %v1280_v11  }
  0x46   : > { %533 = vperm.xlu1 %993, %v280_v13  }
  0x49   : > { %569 = vperm.xlu0 %995, %v280_v13  }
  0x4a   : > { %994 = vset.pattern.permute.xlu1 %v1147_v17 }
  0x4b   : > { %553 = vperm.xlu1 %994, %v1261_v4  }
  0x4d   : > { %996 = vset.pattern.permute.xlu0 %v1148_v18 }
  0x4e   : > { %583 = vperm.xlu0 %996, %v1261_v4  }
  0x4f   : > { %561 = vperm.xlu1 %994, %v1243_v0  }
  0x52   : > { %595 = vperm.xlu0 %996, %v1251_v3  }
  0x53   : > { %565 = vperm.xlu1 %994, %v1251_v3  }
  0x56   : > { %603 = vperm.xlu0 %996, %v1268_v6  }
  0x57   : > { %573 = vperm.xlu1 %994, %v1268_v6  }
  0x5a   : > { %999 = vset.pattern.permute.xlu0 %v1149_v19 }
  0x5b   : > { %997 = vset.pattern.permute.xlu1 %v1148_v18  ;;  %621 = vperm.xlu0 %999, %v1280_v11  }
  0x5c   : > { %587 = vperm.xlu1 %997, %v1280_v11  }
  0x5f   : > { %633 = vperm.xlu0 %999, %v280_v13  }
  0x60   : > { %591 = vperm.xlu1 %997, %v1243_v0  }
  0x63   : > { %1000 = vset.pattern.permute.xlu0 %v1150_v20 }
  0x64   : > { %599 = vperm.xlu1 %997, %v280_v13   ;;  %657 = vperm.xlu0 %1000, %v1261_v4  }
  0x68   : > { %998 = vset.pattern.permute.xlu1 %v1149_v19  ;;  %669 = vperm.xlu0 %1000, %v1251_v3  }
  0x69   : > { %617 = vperm.xlu1 %998, %v1261_v4  }
  0x6c   : > { %677 = vperm.xlu0 %1000, %v1268_v6  }
  0x6d   : > { %625 = vperm.xlu1 %998, %v1243_v0  }
  0x71   : > { %629 = vperm.xlu1 %998, %v1251_v3  }
  0x75   : > { %637 = vperm.xlu1 %998, %v1268_v6  }
  0x79   : > { %1001 = vset.pattern.permute.xlu1 %v1150_v20 }
  0x7a   : > { %661 = vperm.xlu1 %1001, %v1280_v11  }
  0x7e   : > { %665 = vperm.xlu1 %1001, %v1243_v0  }
  0x82   : > { %673 = vperm.xlu1 %1001, %v280_v13  }
  0x91   : > { %v303_v21 = vpop.permute.xlu1 %302 }
  0x94   : > { %v293_v26 = vpop.permute.xlu0 %292 }
  0x95   : > { %v308_v22 = vpop.permute.xlu1 %307 }
  0x98   : > { %v298_v28 = vpop.permute.xlu0 %297 }
  0x99   : > { %v1328_v23 = vpop.permute.xlu1 %317 }
  0x9c   : > { %v313_v30 = vpop.permute.xlu0 %312 }
  0x9e   : > { %v1330_v24 = vpop.permute.xlu1 %449 }
  0xa1   : > { %v1342_v33 = vpop.permute.xlu0 %445 }
  0xa3   : > { %v1332_v25 = vpop.permute.xlu1 %453 }
  0xa5   : > { %v1346_v35 = vpop.permute.xlu0 %457 }
  0xa7   : > { %v1334_v27 = vpop.permute.xlu1 %461 }
  0xa9   : > { %v1352_v38 = vpop.permute.xlu0 %465 }
  0xac   : > { %v1336_v29 = vpop.permute.xlu1 %481 }
  0xae   : > { %v1356_v40 = vpop.permute.xlu0 %485 }
  0xb0   : > { %v1338_v31 = vpop.permute.xlu1 %489 }
  0xb2   : > { %v1360_v42 = vpop.permute.xlu0 %497 }
  0xb4   : > { %v1340_v32 = vpop.permute.xlu1 %493 }
  0xb7   : > { %v1364_v44 = vpop.permute.xlu0 %517 }
  0xb8   : > { %v1344_v34 = vpop.permute.xlu1 %501 }
  0xbb   : > { %v1368_v46 = vpop.permute.xlu0 %529 }
  0xbd   : > { %v1348_v36 = vpop.permute.xlu1 %521 }
  0xbf   : > { %v1372_v48 = vpop.permute.xlu0 %537 }
  0xc1   : > { %v1350_v37 = vpop.permute.xlu1 %525 }
  0xc4   : > { %v1376_v50 = vpop.permute.xlu0 %557 }
  0xc5   : > { %v1354_v39 = vpop.permute.xlu1 %533 }
  0xc8   : > { %v1383_v52 = vpop.permute.xlu0 %569 }
  0xca   : > { %v1358_v41 = vpop.permute.xlu1 %553 }
  0xcd   : > { %v1388_v54 = vpop.permute.xlu0 %583 }
  0xce   : > { %v1362_v43 = vpop.permute.xlu1 %561 }
  0xd1   : > { %v1420_v8 = vpop.permute.xlu0 %595 }
  0xd2   : > { %v1366_v45 = vpop.permute.xlu1 %565 }
  0xd5   : > { %v1444_v17 = vpop.permute.xlu0 %603 }
  0xd6   : > { %v1370_v47 = vpop.permute.xlu1 %573 }
  0xdb   : > { %v1374_v49 = vpop.permute.xlu1 %587 }
  0xdf   : > { %v1378_v51 = vpop.permute.xlu1 %591 }
  0xe3   : > { %v1386_v53 = vpop.permute.xlu1 %599 }
  0xe8   : > { %v1410_v5 = vpop.permute.xlu1 %617 }
  0xec   : > { %v1426_v12 = vpop.permute.xlu1 %625 }
  0xf6   : > { %v383_v55 = vpop.f32.mrb[0].mxu0  ;;  %v391_v57 = vpop.f32.mrb[0].mxu1 }
  0xf7   : > { %v1390_v56 = vadd.f32 %v383_v55, %v293_v26  ;;  %v899_v58 = vpop.f32.mrb[1].mxu0  ;;  %v1392_v59 = vadd.f32 %v391_v57, %v303_v21  ;;  %v903_v60 = vpop.f32.mrb[1].mxu1 }
  0xf8   : > { %v386_v61 = vpop.f32.mrb[2].mxu0  ;;  %v394_v0 = vpop.f32.mrb[2].mxu1 }
  0xf9   : > { %v879_v62 = vmul.f32 -1.442695, %v1390_v56  ;;  %693 = vst.msk [vmem:[%s1397_s17] sm:$0xff] %vm692_vm3, %v1390_v56  ;;  %v1402_v63 = vadd.f32 %v386_v61, %v298_v28  ;;  %v881_v1 = vmul.f32 -1.442695, %v1392_v59  ;;  %695 = vst.msk [vmem:[%s1397_s17 + $0x10] sm:$0xff] %vm692_vm3, %v1392_v59  ;;  %v1408_v2 = vadd.f32 %v394_v0, %v308_v22 }
  0xfa   : > { %v904_v3 = vpop.f32.mrb[3].mxu1  ;;  %v900_v4 = vpop.f32.mrb[3].mxu0 }
  0xfb   : > { %1005 = vpow2.f32 %v879_v62  ;;  %v880_v6 = vmul.f32 -1.442695, %v1402_v63  ;;  %694 = vst.msk [vmem:[%s1397_s17 + $0x8] sm:$0xff] %vm692_vm3, %v1402_v63  ;;  %v882_v7 = vmul.f32 -1.442695, %v1408_v2  ;;  %696 = vst.msk [vmem:[%s1397_s17 + $0x18] sm:$0xff] %vm692_vm3, %v1408_v2 }
  0xfc   : > { %1007 = vpow2.f32 %v881_v1 }
  0xfd   : > { %1009 = vpow2.f32 %v880_v6 }
  0xfe   : > { %1011 = vpow2.f32 %v882_v7  ;;  %v399_v9 = vpop.f32.mrb[4].mxu1 }
  0xff   : > { %v1424_v10 = vadd.f32 %v399_v9, %v313_v30  ;;  %v907_v11 = vpop.f32.mrb[5].mxu1 }
 0x100   : > { %v402_v13 = vpop.f32.mrb[6].mxu1 }
 0x101   : > { %v883_v14 = vmul.f32 -1.442695, %v1424_v10  ;;  %697 = vst.msk [vmem:[%s1397_s17 + $0x20] sm:$0xff] %vm692_vm3, %v1424_v10  ;;  %v1433_v15 = vadd.f32 %v402_v13, %v1328_v23  ;;  %v908_v16 = vpop.f32.mrb[7].mxu1 }
 0x103   : > { %1013 = vpow2.f32 %v883_v14  ;;  %v884_v18 = vmul.f32 -1.442695, %v1433_v15  ;;  %698 = vst.msk [vmem:[%s1397_s17 + $0x28] sm:$0xff] %vm692_vm3, %v1433_v15 }
 0x105   : > { %v1006_v19 = vpop.eup %1005 }
 0x106   : > { %1042 = shalt.err (!%p1039_p5)
}
 0x107   : > { %s1043_s13 = scalar_lea.hbm %s1440_s7, 768  ;;  %s1047_s27 = scalar_lea.hbm %s1611_s5, 1536 }
 0x108   : > { %p1044_p6 = scmp.ne.s32.totalorder %s1440_s7, %s1043_s13  ;;  %p1048_p10 = scmp.lt.u32.totalorder %s1440_s7, %s1611_s5 }
 0x109   : > { %p1049_p11 = scmp.lt.u32.totalorder %s1047_s27, %s1043_s13  ;;  %p1051_p13 = scmp.lt.u32.totalorder %s1043_s13, %s1440_s7 }
 0x10a   : > { %p1045_p7 = pnand %p1044_p6, %p1225_p4 }
 0x10b   : > { %p1050_p12 = por %p1049_p11, %p1048_p10 }
 0x10c   : > { %p1046_p9 = pneg %p1045_p7 }
 0x10d   : > { %p1052_p0 = por %p1051_p13, %p1050_p12 }
 0x10f   : > { %p1053_p1 = pnand %p1052_p0, %p1046_p9 }
 0x111   : > { %1056 = shalt.err (!%p1053_p1)
}
 0x112   : > { %s1152_s9 = smov 128   ;;  %s1153_s11 = smov 8   ;;  %v1008_v20 = vpop.eup %1007  ;;  %v426_v21 = vadd.f32 1.0, %v1006_v19  ;;  %1015 = vpow2.f32 %v884_v18  ;;  %v630_v23 = vpop.permute.xlu1 %629  ;;  %v1480_v58 = vld [vmem:[%s1609_s3] ss:$0 sm:$0xff] }
 0x113   : > { %915 = dma.vmem_to_hbm [thread:$0]  (%p1225_p4), %s1442_s25, 768, %s1440_s7, %s711_s8, %s1152_s9, %s1152_s9, %s1153_s11   ;;  %v1010_v22 = vpop.eup %1009  ;;  %v428_v26 = vadd.f32 1.0, %v1008_v20  ;;  %v622_v57 = vpop.permute.xlu0 %621  ;;  %v611_v3 = vmul.f32 %v1480_v58, %v1374_v49  ;;  %v610_v6 = vmul.f32 %v1480_v58, %v1388_v54  ;;  %v612_v14 = vmul.f32 %v1480_v58, %v1378_v51 }
 0x114   : > { %v1012_v28 = vpop.eup %1011  ;;  %1017 = vrcp.f32 %v426_v21  ;;  %v427_v30 = vadd.f32 1.0, %v1010_v22  ;;  %v1485_v60 = vld [vmem:[%s1609_s3 + $0x1] ss:$0 sm:$0xff]  ;;  %v613_v54 = vmul.f32 %v1480_v58, %v1420_v8  ;;  %v540_v8 = vmul.f32 %v1364_v44, %v1390_v56  ;;  %s256_s8 = scalar_lea.vmem [#allocation2], %s911_s16  ;;  %s1552_s27 = scalar_lea.hbm %s1610_s4, %s912_s24 }
 0x115   : > { %1019 = vrcp.f32 %v428_v26  ;;  %v429_v55 = vadd.f32 1.0, %v1012_v28  ;;  %v1014_v62 = vpop.eup %1013  ;;  %v644_v4 = vmul.f32 %v1485_v60, %v1410_v5  ;;  %v645_v7 = vmul.f32 %v1485_v60, %v622_v57  ;;  %s725_s16 = sshll.u32 %s256_s8, 4  ;;  %s706_s29 = scalar_lea.sflag [#allocation3], %s1381_s15  ;;  %s1554_s16 = int_to_ptr.vmem [resolvable:$true] %s725_s16 }
 0x116   : > { %1021 = vrcp.f32 %v427_v30  ;;  %v1487_v61 = vpop.permute.xlu1 %637  ;;  %v430_v0 = vadd.f32 1.0, %v1014_v62  ;;  %v646_v16 = vmul.f32 %v1485_v60, %v1426_v12  ;;  %v647_v28 = vmul.f32 %v1485_v60, %v630_v23  ;;  %s1057_s10 = scalar_lea.vmem %s1554_s16, 768  ;;  %s1154_s12 = smov [#allocation2]  }
 0x117   : > { %1023 = vrcp.f32 %v429_v55  ;;  %v634_v9 = vpop.permute.xlu0 %633  ;;  %v651_v20 = vadd.f32 %v645_v7, %v611_v3  ;;  %v650_v22 = vadd.f32 %v644_v4, %v610_v6  ;;  %p1058_p2 = scmp.ne.s32.totalorder %s1554_s16, %s1057_s10  ;;  %s1061_s21 = sshll.u32 %s1154_s12, 4  ;;  %s1062_s21 = int_to_ptr.vmem [resolvable:$false] %s1061_s21 }
 0x118   : > { %1025 = vrcp.f32 %v430_v0  ;;  %v652_v12 = vadd.f32 %v646_v16, %v612_v14  ;;  %v653_v44 = vadd.f32 %v647_v28, %v613_v54  ;;  %s1063_s13 = scalar_lea.vmem %s1062_s21, 1536  ;;  %p1064_p6 = scmp.lt.s32.totalorder %s1554_s16, %s1062_s21 }
 0x119   : > { %p1059_p3 = pnand %p1058_p2, %p1225_p4  ;;  %p1065_p7 = scmp.lt.s32.totalorder %s1063_s13, %s1057_s10 }
 0x11a   : > { %v662_v49 = vpop.permute.xlu1 %661 }
 0x11b   : > { %v658_v0 = vpop.permute.xlu0 %657  ;;  %p1060_p5 = pneg %p1059_p3  ;;  %p1066_p9 = por %p1065_p7, %p1064_p6 }
 0x11c   : > { %v1016_v1 = vpop.eup %1015  ;;  %v680_v16 = vadd.f32 %v658_v0, %v650_v22  ;;  %v649_v22 = vmul.f32 %v1485_v60, %v1487_v61 }
 0x11d   : > { %v431_v11 = vadd.f32 1.0, %v1016_v1  ;;  %p1067_p10 = pnand %p1066_p9, %p1060_p5 }
 0x11e   : > { %v1018_v13 = vpop.eup %1017 }
 0x11f   : > { %v1020_v18 = vpop.eup %1019  ;;  %1027 = vrcp.f32 %v431_v11  ;;  %v474_v19 = vmul.f32 %v1018_v13, %v1018_v13  ;;  %v468_v51 = vmul.f32 %v1018_v13, %v1342_v33  ;;  %v542_v33 = vmul.f32 %v1350_v37, %v1392_v59  ;;  %v666_v11 = vpop.permute.xlu1 %665 }
 0x120   : > { %v1022_v5 = vpop.eup %1021  ;;  %v476_v21 = vmul.f32 %v1020_v18, %v1020_v18  ;;  %v470_v57 = vmul.f32 %v1020_v18, %v1332_v25 }
 0x121   : > { %v1024_v26 = vpop.eup %1023  ;;  %v475_v30 = vmul.f32 %v1022_v5, %v1022_v5  ;;  %v504_v55 = vmul.f32 %v1336_v29, %v474_v19  ;;  %v469_v3 = vmul.f32 %v1022_v5, %v1330_v24  ;;  %v543_v24 = vmul.f32 %v1368_v46, %v1408_v2  ;;  %v670_v19 = vpop.permute.xlu0 %669 }
 0x122   : > { %v506_v62 = vmul.f32 %v1338_v31, %v476_v21  ;;  %v477_v1 = vmul.f32 %v1024_v26, %v1024_v26  ;;  %v471_v29 = vmul.f32 %v1024_v26, %v1346_v35  ;;  %v541_v31 = vmul.f32 %v1348_v36, %v1402_v63  ;;  %v1026_v37 = vpop.eup %1025 }
 0x123   : > { %v505_v4 = vmul.f32 %v1356_v40, %v475_v30  ;;  %v510_v23 = vadd.f32 %v504_v55, %v468_v51  ;;  %v648_v40 = vmul.f32 %v1485_v60, %v634_v9  ;;  %v614_v35 = vmul.f32 %v1480_v58, %v1386_v53 }
 0x124   : > { %v512_v6 = vadd.f32 %v506_v62, %v470_v57  ;;  %v507_v25 = vmul.f32 %v1340_v32, %v477_v1  ;;  %v682_v63 = vadd.f32 %v666_v11, %v652_v12  ;;  %v478_v18 = vmul.f32 %v1026_v37, %v1026_v37 }
 0x125   : > { %v511_v7 = vadd.f32 %v505_v4, %v469_v3  ;;  %v546_v13 = vadd.f32 %v540_v8, %v510_v23  ;;  %v681_v9 = vadd.f32 %v662_v49, %v651_v20  ;;  %v683_v21 = vadd.f32 %v670_v19, %v653_v44  ;;  %v678_v12 = vpop.permute.xlu0 %677 }
 0x126   : > { %v548_v56 = vadd.f32 %v542_v33, %v512_v6  ;;  %v513_v14 = vadd.f32 %v507_v25, %v471_v29  ;;  %v472_v53 = vmul.f32 %v1026_v37, %v1334_v27  ;;  %v508_v28 = vmul.f32 %v1360_v42, %v478_v18 }
 0x127   : > { %v547_v59 = vadd.f32 %v541_v31, %v511_v7  ;;  %v576_v32 = vmul.f32 %v1358_v41, %v546_v13  ;;  %v544_v49 = vmul.f32 %v1354_v39, %v1424_v10  ;;  %v654_v61 = vadd.f32 %v648_v40, %v614_v35 }
 0x128   : > { %v578_v36 = vmul.f32 %v1362_v43, %v548_v56  ;;  %v549_v5 = vadd.f32 %v543_v24, %v513_v14  ;;  %v615_v43 = vmul.f32 %v1480_v58, %v1444_v17  ;;  %v514_v27 = vadd.f32 %v508_v28, %v472_v53 }
 0x129   : > { %v1028_v46 = vpop.eup %1027  ;;  %v577_v2 = vmul.f32 %v1376_v50, %v547_v59  ;;  %v686_v54 = vadd.f32 %v680_v16, %v576_v32  ;;  %v545_v20 = vmul.f32 %v1372_v48, %v1433_v15 }
 0x12a   : > { %v688_v26 = vadd.f32 %v682_v63, %v578_v36  ;;  %v579_v41 = vmul.f32 %v1366_v45, %v549_v5  ;;  %v479_v50 = vmul.f32 %v1028_v46, %v1028_v46  ;;  %v674_v45 = vpop.permute.xlu1 %673  ;;  %v473_v17 = vmul.f32 %v1028_v46, %v1352_v38 }
 0x12b   : > { %v687_v30 = vadd.f32 %v681_v9, %v577_v2  ;;  %699 = vst.msk [vmem:[%s256_s8] sm:$0xff] %vm692_vm3, %v686_v54  ;;  %v550_v60 = vadd.f32 %v544_v49, %v514_v27  ;;  %v655_v39 = vadd.f32 %v649_v22, %v615_v43  ;;  %v684_v55 = vadd.f32 %v674_v45, %v654_v61 }
 0x12c   : > { %701 = vst.msk [vmem:[%s256_s8 + $0x10] sm:$0xff] %vm692_vm3, %v688_v26  ;;  %v689_v42 = vadd.f32 %v683_v21, %v579_v41  ;;  %v509_v58 = vmul.f32 %v1344_v34, %v479_v50 }
 0x12d   : > { %700 = vst.msk [vmem:[%s256_s8 + $0x8] sm:$0xff] %vm692_vm3, %v687_v30  ;;  %v580_v51 = vmul.f32 %v1383_v52, %v550_v60  ;;  %v685_v62 = vadd.f32 %v678_v12, %v655_v39 }
 0x12e   : > { %702 = vst.msk [vmem:[%s256_s8 + $0x18] sm:$0xff] %vm692_vm3, %v689_v42  ;;  %v515_v10 = vadd.f32 %v509_v58, %v473_v17 }
 0x12f   : > { %v690_v38 = vadd.f32 %v684_v55, %v580_v51 }
 0x130   : > { %v551_v57 = vadd.f32 %v545_v20, %v515_v10 }
 0x131   : > { %703 = vst.msk [vmem:[%s256_s8 + $0x20] sm:$0xff] %vm692_vm3, %v690_v38 }
 0x132   : > { %v581_v34 = vmul.f32 %v1370_v47, %v551_v57 }
 0x134   : > { %v691_v0 = vadd.f32 %v685_v62, %v581_v34 }
 0x136   : > { %704 = vst.msk [vmem:[%s256_s8 + $0x28] sm:$0xff] %vm692_vm3, %v691_v0 }
 0x137   : > { %1070 = shalt.err (!%p1067_p10)
}
 0x138   : > { %s1071_s24 = scalar_lea.hbm %s1552_s27, 768  ;;  %s1075_s8 = scalar_lea.hbm %s1610_s4, 1536 }
 0x139   : > { %p1072_p11 = scmp.ne.s32.totalorder %s1552_s27, %s1071_s24  ;;  %p1076_p0 = scmp.lt.u32.totalorder %s1552_s27, %s1610_s4 }
 0x13a   : > { %p1077_p1 = scmp.lt.u32.totalorder %s1075_s8, %s1071_s24  ;;  %p1079_p3 = scmp.lt.u32.totalorder %s1071_s24, %s1552_s27 }
 0x13b   : > { %p1073_p12 = pnand %p1072_p11, %p1225_p4 }
 0x13c   : > { %p1078_p2 = por %p1077_p1, %p1076_p0 }
 0x13d   : > { %p1074_p13 = pneg %p1073_p12 }
 0x13e   : > { %p1080_p5 = por %p1079_p3, %p1078_p2 }
 0x140   : > { %p1081_p6 = pnand %p1080_p5, %p1074_p13 }
 0x142   : > { %1084 = shalt.err (!%p1081_p6)
}
 0x143   : > { %914 = dma.vmem_to_hbm [thread:$0]  (%p1225_p4), %s1554_s16, 768, %s1552_s27, %s706_s29, %s1152_s9, %s1152_s9, %s1153_s11  }
 0x144 PF: > { %p925_p7 = scmp.ge.s32.totalorder %s1139_s23, 2  ;;  %s757_s10 = sand.u32 1, %s1119_s18  }
 0x145   : > { %s758_s12 = scalar_lea.sflag [#allocation3], %s757_s10 }
 0x146   : > { %p919_p9 = pnand %p925_p7, %p1232_p8 }
 0x148   : > { %1110 = dma.done.wait (!%p919_p9), %s758_s12, 768  }
 0x149   : > { %1112 = vsyncadd (!%p919_p9), %s758_s12, 4294966528  ;;  %s767_s28 = scalar_lea.sflag [#allocation5], %s757_s10 }
 0x14a   : > { %1114 = dma.done.wait (!%p919_p9), %s767_s28, 768  }
 0x14b   : > { %1116 = vsyncadd (!%p919_p9), %s767_s28, 4294966528  ;;  %s22_s23 = sadd.s32 1, %s1139_s23   ;;  %s1614_s18 = smov %s1123_s19 }
 0x14c   : > { %p19_p10 = scmp.ge.s32.totalorder %s22_s23, 4   ;;  %s1615_s19 = smov %s1127_s20 }
 0x14d   : > { %s1616_s20 = smov %s1238_s6  ;;  %s1617_s21 = smov %s1135_s22 }
 0x14e   : > { %s1618_s22 = smov %s1620_s26  ;;  %21 = sbr.rel (!%p19_p10) target bundleno = 6 (0x6), region = 91 }
 0x155   :  { %772 = vsyncpa [#allocation3], 1 }
 0x156   :  { %774 = vsyncpa [#allocation3 + $0x1], 1 }
 0x157   :  { %775 = vsyncpa [#allocation5], 1 }
 0x158   :  { %777 = vsyncpa [#allocation5 + $0x1], 1 }

</bundles_post_ra>
